<compile_context>
chip_gen: v6e
topology: v6e:2x2x1
jax: 0.10.0
libtpu: 0.0.40
codegen_flags: <defaults>
</compile_context>

<pallas_src>
import functools

import jax
import jax.numpy as jnp
from jax.experimental import pallas as pl
from jax.experimental.pallas import tpu as pltpu

_LANES = 128
# 4096 rows x 128 lanes x 4 B (f32) = 2 MiB per input block; 2 inputs x 2
# pipeline buffers = 8 MiB, inside the default scoped VMEM on v5e (16 MiB),
# v6e (32 MiB) and v7x (32 MiB scoped / 64 MiB physical).  Also a multiple of
# 16 / 32, so bf16 / int8 inputs stay tile-aligned.
_DEFAULT_BLOCK_ROWS = 4096
# At/above this many rows, split into >= 2 grid steps so v7x megacore (2 TCs)
# can shard the "parallel" grid axis; neutral on single-TC v5e/v6e.
_SPLIT_ROWS_THRESHOLD = 512


def _int_pow(x, gamma):
    """x ** gamma, strength-reduced to multiplies for small integer gamma."""
    g = float(gamma)
    if g == int(g) and 0 <= int(g) <= 8:
        gi = int(g)
        if gi == 0:
            return jnp.ones_like(x)
        out = x
        for _ in range(gi - 1):
            out = out * x
        return out
    return x ** jnp.float32(g)


def _focal_elems(p, t, alpha, gamma, binary_targets):
    """Elementwise focal loss in f32 (shared by kernel, JAX tail path, ref)."""
    if binary_targets:
        # Hard-target fast path: 1 transcendental (log) per element.
        pt = jnp.where(t > 0.5, p, 1.0 - p)
        bce = jnp.minimum(-jnp.log(pt), 100.0)
    else:
        # Exact BCELoss semantics (PyTorch clamps the log terms at -100);
        # valid for arbitrary soft targets.
        log_p = jnp.maximum(jnp.log(p), -100.0)
        log_1mp = jnp.maximum(jnp.log(1.0 - p), -100.0)
        bce = -(t * log_p + (1.0 - t) * log_1mp)
        pt = jnp.exp(-bce)
    return (alpha * bce) * _int_pow(1.0 - pt, gamma)


def _focal_loss_kernel(pred_ref, targ_ref, out_ref, *, alpha, gamma,
                       binary_targets, block_rows, rows_total):
    # Cast in-kernel (VPU work hidden under the DMA); HBM keeps the caller's
    # dtype, so bf16 pred / bf16-int8 targets halve HBM bytes with no changes.
    p = pred_ref[...].astype(jnp.float32)
    t = targ_ref[...].astype(jnp.float32)
    focal = _focal_elems(p, t, alpha, gamma, binary_targets)

    partial_last_rows = rows_total % block_rows  # static python int

    if partial_last_rows == 0:
        # Every block is full: no mask at all.
        out_ref[...] = jnp.sum(focal, axis=0, keepdims=True)
    else:
        is_last = pl.program_id(0) == pl.num_programs(0) - 1

        @pl.when(jnp.logical_not(is_last))
        def _():
            out_ref[...] = jnp.sum(focal, axis=0, keepdims=True)

        @pl.when(is_last)
        def _():
            # Only the last grid step can see out-of-bounds rows; mask them
            # with a sublane-only (block_rows, 1) iota before the sum.  The
            # select kills any garbage/NaN from the OOB rows.
            row = jax.lax.broadcasted_iota(jnp.int32, (block_rows, 1), 0)
            valid = row < partial_last_rows
            out_ref[...] = jnp.sum(jnp.where(valid, focal, 0.0),
                                   axis=0, keepdims=True)


def focal_loss(pred, target, alpha=0.8, gamma=2, binary_targets=False):
    """Binary focal loss (mean reduction), computed in a Pallas TPU kernel.

    Set binary_targets=True when targets are hard 0/1 labels to use the
    1-transcendental fast path (opt-in; the default path matches PyTorch
    BCELoss for arbitrary soft targets).  Passing bf16 pred / bf16-or-int8
    targets is supported and halves HBM traffic (cast happens in-kernel).
    """
    assert pred.shape == target.shape
    n_valid = pred.size
    assert n_valid > 0
    alpha = float(alpha)

    # Free reshape for contiguous inputs; keep the caller's dtype on HBM side.
    pred_flat = jnp.ravel(pred)
    targ_flat = jnp.ravel(target)

    tail_sum = jnp.float32(0.0)
    if n_valid < _LANES:
        # Tiny input: pad to one (1, 128) row with 1s (pred=target=1 yields
        # focal == 0 on both paths), so the kernel covers everything.
        pad = _LANES - n_valid
        pred_flat = jnp.pad(pred_flat, (0, pad), constant_values=1)
        targ_flat = jnp.pad(targ_flat, (0, pad), constant_values=1)
        rows = 1
    else:
        rows = n_valid // _LANES
        n_main = rows * _LANES
        rem = n_valid - n_main
        if rem:
            # Ragged tail (< 128 elements): sum in plain JAX instead of a
            # full-array jnp.pad (which would add an extra HBM read+write of
            # both inputs).
            tp = pred_flat[n_main:].astype(jnp.float32)
            tt = targ_flat[n_main:].astype(jnp.float32)
            tail_sum = jnp.sum(_focal_elems(tp, tt, alpha, gamma, binary_targets))
            pred_flat = pred_flat[:n_main]
            targ_flat = targ_flat[:n_main]

    pred_2d = pred_flat.reshape(rows, _LANES)
    targ_2d = targ_flat.reshape(rows, _LANES)

    # Block rows: full extent for small inputs; otherwise split into >= 2 grid
    # steps (v7x megacore) and cap at _DEFAULT_BLOCK_ROWS, keeping the block a
    # multiple of 8 sublanes.
    if rows >= _SPLIT_ROWS_THRESHOLD:
        half = -(-rows // 2)                   # ceil(rows / 2)
        half = ((half + 7) // 8) * 8           # round up to sublane multiple
        block_rows = min(half, _DEFAULT_BLOCK_ROWS)
    else:
        block_rows = rows
    num_tiles = -(-rows // block_rows)

    kernel = functools.partial(
        _focal_loss_kernel,
        alpha=alpha,
        gamma=gamma,
        binary_targets=binary_targets,
        block_rows=block_rows,
        rows_total=rows,
    )

    partials = pl.pallas_call(
        kernel,
        out_shape=jax.ShapeDtypeStruct((num_tiles, _LANES), jnp.float32),
        grid_spec=pltpu.PrefetchScalarGridSpec(
            num_scalar_prefetch=0,
            grid=(num_tiles,),
            in_specs=[
                pl.BlockSpec((block_rows, _LANES), lambda i: (i, 0)),
                pl.BlockSpec((block_rows, _LANES), lambda i: (i, 0)),
            ],
            out_specs=pl.BlockSpec((1, _LANES), lambda i: (i, 0)),
            # NOTE: pipeline_mode=pl.Buffered(3) on the input specs is a
            # possible follow-up once measured; left at the default depth.
        ),
        compiler_params=pltpu.CompilerParams(
            # No cross-step carry -> "parallel": lets v7x shard the grid across
            # both TensorCores; measured-neutral on single-TC v5e/v6e.
            dimension_semantics=("parallel",),
        ),
    )(pred_2d, targ_2d)

    # Tiny final reduction + multiply by precomputed 1/n (no divide on device).
    return (jnp.sum(partials) + tail_sum) * jnp.float32(1.0 / n_valid)


def focal_loss_ref(pred, target, alpha=0.8, gamma=2):
    """Pure-JAX reference matching the PyTorch module."""
    p = pred.astype(jnp.float32)
    t = target.astype(jnp.float32)
    log_p = jnp.maximum(jnp.log(p), -100.0)
    log_1mp = jnp.maximum(jnp.log(1.0 - p), -100.0)
    bce = -(t * log_p + (1.0 - t) * log_1mp)
    pt = jnp.exp(-bce)
    focal = alpha * (1.0 - pt) ** gamma * bce
    return jnp.mean(focal)


if __name__ == "__main__":
    key = jax.random.PRNGKey(0)
    k1, k2, k3, k4, k5, k6, k7, k8, k9, k10 = jax.random.split(key, 10)

    # 1) NCHW probabilities / binary masks (no-pad, single-tile path).
    shape = (2, 4, 16, 16)
    pred = jax.nn.sigmoid(jax.random.normal(k1, shape, dtype=jnp.float32))
    target = (jax.random.uniform(k2, shape) > 0.5).astype(jnp.float32)
    out = jax.block_until_ready(focal_loss(pred, target, alpha=0.8, gamma=2))
    ref = focal_loss_ref(pred, target, alpha=0.8, gamma=2)
    assert jnp.allclose(out, ref, rtol=1e-4, atol=1e-6), (out, ref)

    # 2) Ragged size (exercises the plain-JAX tail path, no full-array pad).
    shape2 = (2, 3, 7, 5)
    pred2 = jax.nn.sigmoid(jax.random.normal(k3, shape2, dtype=jnp.float32))
    target2 = (jax.random.uniform(k4, shape2) > 0.5).astype(jnp.float32)
    out2 = jax.block_until_ready(focal_loss(pred2, target2, alpha=0.8, gamma=2))
    ref2 = focal_loss_ref(pred2, target2, alpha=0.8, gamma=2)
    assert jnp.allclose(out2, ref2, rtol=1e-4, atol=1e-6), (out2, ref2)

    # 3) Multi-tile grid (exercises the split-grid / partial-sum path).
    shape3 = (2, 4, 128, 128)
    pred3 = jax.nn.sigmoid(jax.random.normal(k5, shape3, dtype=jnp.float32))
    target3 = (jax.random.uniform(k6, shape3) > 0.5).astype(jnp.float32)
    out3 = jax.block_until_ready(focal_loss(pred3, target3, alpha=0.8, gamma=2))
    ref3 = focal_loss_ref(pred3, target3, alpha=0.8, gamma=2)
    assert jnp.allclose(out3, ref3, rtol=1e-4, atol=1e-6), (out3, ref3)

    # 3b) Same data through the opt-in binary-target fast path (1 log / elem).
    out3b = jax.block_until_ready(
        focal_loss(pred3, target3, alpha=0.8, gamma=2, binary_targets=True))
    assert jnp.allclose(out3b, ref3, rtol=1e-4, atol=1e-6), (out3b, ref3)

    # 4) Partial last block (rows % block_rows != 0 -> in-kernel row mask).
    shape4 = (650, 128)
    pred4 = jax.nn.sigmoid(jax.random.normal(k7, shape4, dtype=jnp.float32))
    target4 = (jax.random.uniform(k8, shape4) > 0.5).astype(jnp.float32)
    out4 = jax.block_until_ready(focal_loss(pred4, target4, alpha=0.8, gamma=2))
    ref4 = focal_loss_ref(pred4, target4, alpha=0.8, gamma=2)
    assert jnp.allclose(out4, ref4, rtol=1e-4, atol=1e-6), (out4, ref4)

    # 5) Tiny input (< 128 elements -> single padded row).
    shape5 = (3, 5, 2)
    pred5 = jax.nn.sigmoid(jax.random.normal(k9, shape5, dtype=jnp.float32))
    target5 = (jax.random.uniform(k10, shape5) > 0.5).astype(jnp.float32)
    out5 = jax.block_until_ready(focal_loss(pred5, target5, alpha=0.8, gamma=2))
    ref5 = focal_loss_ref(pred5, target5, alpha=0.8, gamma=2)
    assert jnp.allclose(out5, ref5, rtol=1e-4, atol=1e-6), (out5, ref5)

    print("KERNEL_OK")
</pallas_src>

<mosaic_0001>
module attributes {stable_mosaic.version = 11 : i64} {
  func.func @_focal_loss_kernel(%arg0: i32, %arg1: memref<16x128xf32, #tpu.memory_space<vmem>>, %arg2: memref<16x128xf32, #tpu.memory_space<vmem>>, %arg3: memref<1x128xf32, #tpu.memory_space<vmem>>) attributes {dimension_semantics = [#tpu.dimension_semantics<parallel>], iteration_bounds = array<i64: 1>, scalar_prefetch = 0 : i64, scratch_operands = 0 : i64, tpu.core_type = #tpu.core_type<tc>, window_params = [{transform_indices = @transform_0, window_bounds = array<i64: 16, 128>}, {transform_indices = @transform_1, window_bounds = array<i64: 16, 128>}, {transform_indices = @transform_2, window_bounds = array<i64: 1, 128>}]} {
    %c0 = arith.constant 0 : index
    %c0_0 = arith.constant 0 : index
    %0 = vector.load %arg1[%c0, %c0_0] : memref<16x128xf32, #tpu.memory_space<vmem>>, vector<16x128xf32>
    %c0_1 = arith.constant 0 : index
    %c0_2 = arith.constant 0 : index
    %1 = vector.load %arg2[%c0_1, %c0_2] : memref<16x128xf32, #tpu.memory_space<vmem>>, vector<16x128xf32>
    %2 = math.log %0 : vector<16x128xf32>
    %cst = arith.constant -1.000000e+02 : f32
    %3 = vector.broadcast %cst : f32 to vector<16x128xf32>
    %4 = arith.maximumf %2, %3 : vector<16x128xf32>
    %cst_3 = arith.constant 1.000000e+00 : f32
    %5 = vector.broadcast %cst_3 : f32 to vector<16x128xf32>
    %6 = arith.subf %5, %0 : vector<16x128xf32>
    %7 = math.log %6 : vector<16x128xf32>
    %cst_4 = arith.constant -1.000000e+02 : f32
    %8 = vector.broadcast %cst_4 : f32 to vector<16x128xf32>
    %9 = arith.maximumf %7, %8 : vector<16x128xf32>
    %10 = arith.mulf %1, %4 : vector<16x128xf32>
    %cst_5 = arith.constant 1.000000e+00 : f32
    %11 = vector.broadcast %cst_5 : f32 to vector<16x128xf32>
    %12 = arith.subf %11, %1 : vector<16x128xf32>
    %13 = arith.mulf %12, %9 : vector<16x128xf32>
    %14 = arith.addf %10, %13 : vector<16x128xf32>
    %cst_6 = arith.constant 0.000000e+00 : f32
    %15 = vector.broadcast %cst_6 : f32 to vector<16x128xf32>
    %16 = arith.subf %15, %14 : vector<16x128xf32>
    %cst_7 = arith.constant 0.000000e+00 : f32
    %17 = vector.broadcast %cst_7 : f32 to vector<16x128xf32>
    %18 = arith.subf %17, %16 : vector<16x128xf32>
    %19 = math.exp %18 : vector<16x128xf32>
    %cst_8 = arith.constant 8.000000e-01 : f32
    %20 = vector.broadcast %cst_8 : f32 to vector<16x128xf32>
    %21 = arith.mulf %20, %16 : vector<16x128xf32>
    %cst_9 = arith.constant 1.000000e+00 : f32
    %22 = vector.broadcast %cst_9 : f32 to vector<16x128xf32>
    %23 = arith.subf %22, %19 : vector<16x128xf32>
    %24 = arith.mulf %23, %23 : vector<16x128xf32>
    %25 = arith.mulf %21, %24 : vector<16x128xf32>
    %cst_10 = arith.constant dense<0.000000e+00> : vector<128xf32>
    %26 = vector.multi_reduction <add>, %25, %cst_10 [0] : vector<16x128xf32> to vector<128xf32>
    %27 = vector.shape_cast %26 : vector<128xf32> to vector<1x128xf32>
    %c0_11 = arith.constant 0 : index
    %c0_12 = arith.constant 0 : index
    %28 = vector.load %arg3[%c0_11, %c0_12] : memref<1x128xf32, #tpu.memory_space<vmem>>, vector<1x128xf32>
    tpu.vector_store %arg3[%c0_11, %c0_12], %27 {strides = array<i32>} : memref<1x128xf32, #tpu.memory_space<vmem>>, vector<1x128xf32>,
    return
  }
  func.func @transform_0(%arg0: i32) -> (i32, i32) {
    %c0_i32 = arith.constant 0 : i32
    %c0_i32_0 = arith.constant 0 : i32
    return %arg0, %c0_i32 : i32, i32
  }
  func.func @transform_1(%arg0: i32) -> (i32, i32) {
    %c0_i32 = arith.constant 0 : i32
    %c0_i32_0 = arith.constant 0 : i32
    return %arg0, %c0_i32 : i32, i32
  }
  func.func @transform_2(%arg0: i32) -> (i32, i32) {
    %c0_i32 = arith.constant 0 : i32
    %c0_i32_0 = arith.constant 0 : i32
    return %arg0, %c0_i32 : i32, i32
  }
}

</mosaic_0001>

<bundles_post_ra>
// kernel: tpu_custom_call.1
= control target key start
LH: loop header
LB: loop body
LE: loop exit
PB: predicated region body
PF: predicated region fallthrough
CT: control target
= control target key end

     0   :  { %7 = vsyncpa [#allocation3], 0  ;;  %s218_s0 = inlined_call_operand.hbm [shape: f32[16,128], index: 0, kind: input, shape index: {}]   ;;  %s219_s1 = inlined_call_operand.hbm [shape: f32[16,128], index: 1, kind: input, shape index: {}]   ;;  %s220_s2 = inlined_call_operand.hbm [shape: f32[1,128], index: 2, kind: output, shape index: {}]  }
   0x1   :  { %8 = vsyncpa [#allocation6], 0 }
   0x2   :  { %9 = vsyncpa [#allocation4], 0  ;;  %s189_s9 = smov [#allocation2]  }
   0x3   :  { %s15_s10 = sshll.u32 %s189_s9, 4  ;;  %s16_s10 = int_to_ptr.vmem [resolvable:$true] %s15_s10 }
   0x4   :  { %s131_s11 = scalar_lea.vmem %s16_s10, 256  ;;  %p136_p1 = scmp.lt.s32.totalorder %s16_s10, %s16_s10 }
   0x5   :  { %p132_p0 = scmp.ne.s32.totalorder %s16_s10, %s131_s11  ;;  %p137_p2 = scmp.lt.s32.totalorder %s131_s11, %s131_s11 }
   0x7   :  { %p138_p3 = por %p137_p2, %p136_p1 }
   0x9   :  { %p139_p4 = pnand %p138_p3, %p132_p0 }
   0xb   :  { %142 = shalt.err (!%p139_p4)
}
   0xc   :  { %s190_s12 = smov 128   ;;  %s191_s13 = smov 8  }
   0xd   :  { %21 = dma.hbm_to_vmem [thread:$0]  %s218_s0, 256, %s16_s10, [#allocation3], %s190_s12, %s190_s12, %s191_s13  }
   0xe   :  { %s192_s16 = smov [#allocation5]  }
   0xf   :  { %s27_s17 = sshll.u32 %s192_s16, 4  ;;  %s28_s17 = int_to_ptr.vmem [resolvable:$true] %s27_s17 }
  0x10   :  { %s151_s18 = scalar_lea.vmem %s28_s17, 256  ;;  %p156_p6 = scmp.lt.s32.totalorder %s28_s17, %s28_s17 }
  0x11   :  { %p152_p5 = scmp.ne.s32.totalorder %s28_s17, %s151_s18  ;;  %p157_p7 = scmp.lt.s32.totalorder %s151_s18, %s151_s18 }
  0x13   :  { %p158_p8 = por %p157_p7, %p156_p6 }
  0x15   :  { %p159_p9 = pnand %p158_p8, %p152_p5 }
  0x17   :  { %162 = shalt.err (!%p159_p9)
}
  0x18   :  { %33 = dma.hbm_to_vmem [thread:$0]  %s219_s1, 256, %s28_s17, [#allocation6], %s190_s12, %s190_s12, %s191_s13  }
  0x19   :  { %183 = dma.done.wait [#allocation3], 256  }
  0x1a   :  { %184 = vsyncadd [#allocation3], 4294967040 }
  0x1b   :  { %185 = dma.done.wait [#allocation6], 256  }
  0x1c   :  { %186 = vsyncadd [#allocation6], 4294967040  ;;  %v40_v0 = vld [vmem:[#allocation2] sm:$0xff]  ;;  %v41_v1 = vld [vmem:[#allocation2 + $0x8] sm:$0xff]  ;;  %s193_s0 = smov [#allocation7]  }
  0x1d   :  { %111 = vlog2.f32 %v40_v0  ;;  %v50_v2 = vsub.f32 1.0, %v40_v0  ;;  %v51_v3 = vsub.f32 1.0, %v41_v1  ;;  %v42_v5 = vld [vmem:[#allocation5] sm:$0xff]  ;;  %v43_v7 = vld [vmem:[#allocation5 + $0x8] sm:$0xff]  ;;  %s96_s1 = sshll.u32 %s193_s0, 4  ;;  %s97_s1 = int_to_ptr.vmem [resolvable:$true] %s96_s1 }
  0x1e   :  { %113 = vlog2.f32 %v41_v1  ;;  %v60_v14 = vsub.f32 1.0, %v42_v5  ;;  %v61_v17 = vsub.f32 1.0, %v43_v7  ;;  %s163_s21 = scalar_lea.vmem %s97_s1, 16  ;;  %s167_s22 = scalar_lea.vmem %s97_s1, 32 }
  0x1f   :  { %115 = vlog2.f32 %v50_v2  ;;  %p164_p10 = scmp.ne.s32.totalorder %s97_s1, %s163_s21  ;;  %p168_p11 = scmp.lt.s32.totalorder %s97_s1, %s97_s1 }
  0x20   :  { %117 = vlog2.f32 %v51_v3  ;;  %p169_p12 = scmp.lt.s32.totalorder %s167_s22, %s163_s21 }
  0x22   :  { %p170_p13 = por %p169_p12, %p168_p11 }
  0x24   :  { %p171_p0 = pnand %p170_p13, %p164_p10 }
  0x2a   :  { %v112_v4 = vpop.eup %111 }
  0x2b   :  { %v114_v6 = vpop.eup %113  ;;  %v45_v8 = vmul.f32 0.6931472, %v112_v4 }
  0x2c   :  { %v116_v9 = vpop.eup %115  ;;  %v47_v10 = vmul.f32 0.6931472, %v114_v6 }
  0x2d   :  { %v118_v11 = vpop.eup %117  ;;  %v48_v12 = vmax.f32 %v45_v8, -100.0  ;;  %v53_v13 = vmul.f32 0.6931472, %v116_v9 }
  0x2e   :  { %v49_v15 = vmax.f32 %v47_v10, -100.0  ;;  %v55_v16 = vmul.f32 0.6931472, %v118_v11 }
  0x2f   :  { %v56_v18 = vmax.f32 %v53_v13, -100.0  ;;  %v58_v19 = vmul.f32 %v48_v12, %v42_v5 }
  0x30   :  { %v57_v20 = vmax.f32 %v55_v16, -100.0  ;;  %v59_v21 = vmul.f32 %v49_v15, %v43_v7 }
  0x31   :  { %v62_v22 = vmul.f32 %v60_v14, %v56_v18 }
  0x32   :  { %v63_v23 = vmul.f32 %v61_v17, %v57_v20 }
  0x33   :  { %v64_v24 = vadd.f32 %v62_v22, %v58_v19 }
  0x34   :  { %v65_v25 = vadd.f32 %v63_v23, %v59_v21 }
  0x35   :  { %v66_v26 = vsub.f32 0.0, %v64_v24 }
  0x36   :  { %v67_v27 = vsub.f32 0.0, %v65_v25 }
  0x37   :  { %v68_v28 = vsub.f32 0.0, %v66_v26  ;;  %v74_v34 = vmul.f32 0.8, %v66_v26 }
  0x38   :  { %v69_v29 = vsub.f32 0.0, %v67_v27  ;;  %v75_v36 = vmul.f32 0.8, %v67_v27 }
  0x39   :  { %v70_v30 = vmul.f32 1.442695, %v68_v28 }
  0x3a   :  { %v72_v31 = vmul.f32 1.442695, %v69_v29 }
  0x3b   :  { %119 = vpow2.f32 %v70_v30 }
  0x3c   :  { %121 = vpow2.f32 %v72_v31 }
  0x48   :  { %v120_v32 = vpop.eup %119 }
  0x49   :  { %v122_v33 = vpop.eup %121  ;;  %v76_v35 = vsub.f32 1.0, %v120_v32 }
  0x4a   :  { %v77_v37 = vsub.f32 1.0, %v122_v33 }
  0x4b   :  { %v78_v38 = vmul.f32 %v76_v35, %v76_v35 }
  0x4c   :  { %v79_v39 = vmul.f32 %v77_v37, %v77_v37 }
  0x4d   :  { %v80_v40 = vmul.f32 %v78_v38, %v74_v34 }
  0x4e   :  { %v81_v41 = vmul.f32 %v79_v39, %v75_v36 }
  0x50   :  { %v82_v42 = vadd.f32 %v81_v41, %v80_v40 }
  0x52   :  { %v83_v43 = vrot.slane %v82_v42, 4 }
  0x54   :  { %v84_v44 = vadd.f32 %v83_v43, %v82_v42 }
  0x56   :  { %v85_v45 = vrot.slane %v84_v44, 2 }
  0x58   :  { %v86_v46 = vadd.f32 %v85_v45, %v84_v44 }
  0x5a   :  { %v87_v47 = vrot.slane %v86_v46, 1 }
  0x5c   :  { %v88_v48 = vadd.f32 %v87_v47, %v86_v46 }
  0x5e   :  { %89 = vst [vmem:[#allocation7] sm:$0x1] %v88_v48 }
  0x5f   :  { %174 = shalt.err (!%p171_p0)
}
  0x60   :  { %99 = dma.vmem_to_hbm [thread:$0]  %s97_s1, 16, %s220_s2, [#allocation4]  }
  0x61   :  { %187 = dma.done.wait [#allocation4], 16  }
  0x62   :  { %188 = vsyncadd [#allocation4], 4294967280 }
  0x63   :  { %103 = vsyncpa [#allocation3], 1 }
  0x64   :  { %104 = vsyncpa [#allocation6], 1 }
  0x65   :  { %105 = vsyncpa [#allocation4], 1 }

</bundles_post_ra>
